<compile_context>
chip_gen: v7x
topology: tpu7x:2x2x1
jax: 0.10.0
libtpu: 0.0.40
codegen_flags: <defaults>
</compile_context>

<pallas_src>
import functools

import jax
import jax.numpy as jnp
from jax.experimental import pallas as pl
from jax.experimental.pallas import tpu as pltpu

_LANE = 128     # lane width (last dim granularity)
_SUBLANE = 8    # f32 sublane granularity (second-to-last dim)


def _round_up(n, m):
    return ((n + m - 1) // m) * m


def _pad_to(a, shape):
    pads = [(0, t - s) for s, t in zip(a.shape, shape)]
    if all(p == (0, 0) for p in pads):
        return a
    return jnp.pad(a, pads)


def _mlp_kernel(x_ref, w1_ref, b1_ref, w2_ref, b2_ref, w3_ref, b3_ref, o_ref):
    # --- Linear 1 + ReLU (Dropout(0.5) = identity in eval mode) ---
    # TODO(synk): training-mode Dropout (stochastic masking via
    # pltpu.prng_random_bits) intentionally omitted; eval-mode identity used.
    h1 = jnp.dot(x_ref[...], w1_ref[...], preferred_element_type=jnp.float32)
    h1 = jnp.maximum(h1 + b1_ref[...], 0.0)

    # --- Linear 2 + ReLU ---
    h2 = jnp.dot(h1.astype(jnp.bfloat16), w2_ref[...],
                 preferred_element_type=jnp.float32)
    h2 = jnp.maximum(h2 + b2_ref[...], 0.0)

    # --- Linear 3 + Sigmoid ---
    logits = jnp.dot(h2.astype(jnp.bfloat16), w3_ref[...],
                     preferred_element_type=jnp.float32)
    logits = logits + b3_ref[...]
    # sigmoid(x) = 1 / (1 + exp(-x)); exp + reciprocal both on the EUP path.
    o_ref[...] = pl.reciprocal(1.0 + jnp.exp(-logits), approx=True)


@functools.partial(jax.jit, static_argnames=("batch_tile",))
def classifier_forward(x, params, *, batch_tile=256):
    """Fused MLP forward. x: [B, input_dim] f32. Returns [B, num_classes] f32."""
    w1, b1, w2, b2, w3, b3 = params
    B, in_dim = x.shape
    h = w1.shape[1]
    hh = w2.shape[1]
    c = w3.shape[1]

    # Lane-pad every feature dimension to 128.
    in_p = _round_up(in_dim, _LANE)
    h_p = _round_up(h, _LANE)
    hh_p = _round_up(hh, _LANE)
    c_p = _round_up(c, _LANE)

    # Batch tile: multiple of the f32 sublane (8), capped by batch_tile.
    tb = min(batch_tile, _round_up(B, _SUBLANE))
    b_p = _round_up(B, tb)

    # Pad + cast MXU inputs to bf16 (f32 accumulation happens in-kernel).
    x_p = _pad_to(x, (b_p, in_p)).astype(jnp.bfloat16)
    w1_p = _pad_to(w1, (in_p, h_p)).astype(jnp.bfloat16)
    w2_p = _pad_to(w2, (h_p, hh_p)).astype(jnp.bfloat16)
    w3_p = _pad_to(w3, (hh_p, c_p)).astype(jnp.bfloat16)
    b1_p = _pad_to(b1, (1, h_p)).astype(jnp.float32)
    b2_p = _pad_to(b2, (1, hh_p)).astype(jnp.float32)
    b3_p = _pad_to(b3, (1, c_p)).astype(jnp.float32)

    grid = (b_p // tb,)

    # Advisory cost estimate for XLA's scheduler.
    flops = 2 * b_p * (in_p * h_p + h_p * hh_p + hh_p * c_p)
    bytes_accessed = (
        x_p.size * 2 + w1_p.size * 2 + w2_p.size * 2 + w3_p.size * 2
        + (b1_p.size + b2_p.size + b3_p.size) * 4 + b_p * c_p * 4)
    cost = pl.CostEstimate(flops=flops, transcendentals=b_p * c_p,
                           bytes_accessed=bytes_accessed)

    def _tiled(i):
        return (i, 0)

    def _resident(i):
        return (0, 0)   # constant block index -> weights stay in VMEM

    out = pl.pallas_call(
        _mlp_kernel,
        out_shape=jax.ShapeDtypeStruct((b_p, c_p), jnp.float32),
        grid=grid,
        in_specs=[
            pl.BlockSpec((tb, in_p), _tiled),      # x     (streamed per tile)
            pl.BlockSpec((in_p, h_p), _resident),  # w1    (resident)
            pl.BlockSpec((1, h_p), _resident),     # b1
            pl.BlockSpec((h_p, hh_p), _resident),  # w2
            pl.BlockSpec((1, hh_p), _resident),    # b2
            pl.BlockSpec((hh_p, c_p), _resident),  # w3
            pl.BlockSpec((1, c_p), _resident),     # b3
        ],
        out_specs=pl.BlockSpec((tb, c_p), _tiled),
        compiler_params=pltpu.CompilerParams(
            dimension_semantics=("parallel",)),
        cost_estimate=cost,
    )(x_p, w1_p, b1_p, w2_p, b2_p, w3_p, b3_p)

    # Drop batch padding and the padded (garbage-sigmoid) class columns.
    return out[:B, :c]


def init_params(key, input_dim, hidden_dim, num_classes):
    """Deterministic PyTorch-style (uniform +/- 1/sqrt(fan_in)) init."""
    def linear_init(k, fan_in, fan_out):
        kw, kb = jax.random.split(k)
        bound = 1.0 / jnp.sqrt(float(fan_in))
        w = jax.random.uniform(kw, (fan_in, fan_out), jnp.float32, -bound, bound)
        b = jax.random.uniform(kb, (1, fan_out), jnp.float32, -bound, bound)
        return w, b

    k1, k2, k3 = jax.random.split(key, 3)
    w1, b1 = linear_init(k1, input_dim, hidden_dim)
    w2, b2 = linear_init(k2, hidden_dim, hidden_dim // 2)
    w3, b3 = linear_init(k3, hidden_dim // 2, num_classes)
    return (w1, b1, w2, b2, w3, b3)


def _reference_forward(x, params):
    """Pure-JAX reference (eval-mode dropout = identity)."""
    w1, b1, w2, b2, w3, b3 = params
    h1 = jnp.maximum(x @ w1 + b1, 0.0)
    h2 = jnp.maximum(h1 @ w2 + b2, 0.0)
    return jax.nn.sigmoid(h2 @ w3 + b3)


if __name__ == "__main__":
    batch = 256          # exercises a 2-step batch grid with batch_tile=128
    input_dim = 32
    hidden_dim = 64
    num_classes = 4

    key = jax.random.PRNGKey(0)
    k_x, k_p = jax.random.split(key)

    x = jax.random.normal(k_x, (batch, input_dim), dtype=jnp.float32)
    params = init_params(k_p, input_dim, hidden_dim, num_classes)

    out = classifier_forward(x, params, batch_tile=128)
    out = jax.block_until_ready(out)

    # Sanity: shape, sigmoid range, and numerics vs. f32 reference
    # (bf16 matmul inputs + approx reciprocal -> loose tolerance).
    assert out.shape == (batch, num_classes)
    assert bool(jnp.all(out >= 0.0)) and bool(jnp.all(out <= 1.0))
    ref = _reference_forward(x, params)
    assert bool(jnp.all(jnp.abs(out - ref) < 2e-2)), float(
        jnp.max(jnp.abs(out - ref)))

    print("KERNEL_OK")
</pallas_src>

<mosaic_0001>
module attributes {stable_mosaic.version = 11 : i64} {
  func.func @_mlp_kernel(%arg0: i32, %arg1: memref<128x128xbf16, #tpu.memory_space<vmem>>, %arg2: memref<128x128xbf16, #tpu.memory_space<vmem>>, %arg3: memref<1x128xf32, #tpu.memory_space<vmem>>, %arg4: memref<128x128xbf16, #tpu.memory_space<vmem>>, %arg5: memref<1x128xf32, #tpu.memory_space<vmem>>, %arg6: memref<128x128xbf16, #tpu.memory_space<vmem>>, %arg7: memref<1x128xf32, #tpu.memory_space<vmem>>, %arg8: memref<128x128xf32, #tpu.memory_space<vmem>>) attributes {dimension_semantics = [#tpu.dimension_semantics<parallel>], iteration_bounds = array<i64: 2>, scalar_prefetch = 0 : i64, scratch_operands = 0 : i64, tpu.core_type = #tpu.core_type<tc>, window_params = [{transform_indices = @transform_0, window_bounds = array<i64: 128, 128>}, {pipeline_mode = #tpu.pipeline_mode<synchronous>, transform_indices = @transform_1, window_bounds = array<i64: 128, 128>}, {pipeline_mode = #tpu.pipeline_mode<synchronous>, transform_indices = @transform_2, window_bounds = array<i64: 1, 128>}, {pipeline_mode = #tpu.pipeline_mode<synchronous>, transform_indices = @transform_3, window_bounds = array<i64: 128, 128>}, {pipeline_mode = #tpu.pipeline_mode<synchronous>, transform_indices = @transform_4, window_bounds = array<i64: 1, 128>}, {pipeline_mode = #tpu.pipeline_mode<synchronous>, transform_indices = @transform_5, window_bounds = array<i64: 128, 128>}, {pipeline_mode = #tpu.pipeline_mode<synchronous>, transform_indices = @transform_6, window_bounds = array<i64: 1, 128>}, {transform_indices = @transform_7, window_bounds = array<i64: 128, 128>}]} {
    %c0 = arith.constant 0 : index
    %c0_0 = arith.constant 0 : index
    %0 = vector.load %arg1[%c0, %c0_0] : memref<128x128xbf16, #tpu.memory_space<vmem>>, vector<128x128xbf16>
    %c0_1 = arith.constant 0 : index
    %c0_2 = arith.constant 0 : index
    %1 = vector.load %arg2[%c0_1, %c0_2] : memref<128x128xbf16, #tpu.memory_space<vmem>>, vector<128x128xbf16>
    %cst = arith.constant dense<0.000000e+00> : vector<128x128xf32>
    %2 = tpu.matmul %0, %1, %cst {dimension_numbers = #tpu.dot_dimension_numbers<[1], [0], [0], [1], [0, 0, 1, 1], [], []>} : vector<128x128xbf16>, vector<128x128xbf16>, vector<128x128xf32> -> vector<128x128xf32>
    %c0_3 = arith.constant 0 : index
    %c0_4 = arith.constant 0 : index
    %3 = vector.load %arg3[%c0_3, %c0_4] : memref<1x128xf32, #tpu.memory_space<vmem>>, vector<1x128xf32>
    %4 = vector.broadcast %3 : vector<1x128xf32> to vector<128x128xf32>
    %5 = arith.addf %2, %4 : vector<128x128xf32>
    %cst_5 = arith.constant 0.000000e+00 : f32
    %6 = vector.broadcast %cst_5 : f32 to vector<128x128xf32>
    %7 = arith.maximumf %5, %6 : vector<128x128xf32>
    %8 = arith.truncf %7 : vector<128x128xf32> to vector<128x128xbf16>
    %c0_6 = arith.constant 0 : index
    %c0_7 = arith.constant 0 : index
    %9 = vector.load %arg4[%c0_6, %c0_7] : memref<128x128xbf16, #tpu.memory_space<vmem>>, vector<128x128xbf16>
    %cst_8 = arith.constant dense<0.000000e+00> : vector<128x128xf32>
    %10 = tpu.matmul %8, %9, %cst_8 {dimension_numbers = #tpu.dot_dimension_numbers<[1], [0], [0], [1], [0, 0, 1, 1], [], []>} : vector<128x128xbf16>, vector<128x128xbf16>, vector<128x128xf32> -> vector<128x128xf32>
    %c0_9 = arith.constant 0 : index
    %c0_10 = arith.constant 0 : index
    %11 = vector.load %arg5[%c0_9, %c0_10] : memref<1x128xf32, #tpu.memory_space<vmem>>, vector<1x128xf32>
    %12 = vector.broadcast %11 : vector<1x128xf32> to vector<128x128xf32>
    %13 = arith.addf %10, %12 : vector<128x128xf32>
    %cst_11 = arith.constant 0.000000e+00 : f32
    %14 = vector.broadcast %cst_11 : f32 to vector<128x128xf32>
    %15 = arith.maximumf %13, %14 : vector<128x128xf32>
    %16 = arith.truncf %15 : vector<128x128xf32> to vector<128x128xbf16>
    %c0_12 = arith.constant 0 : index
    %c0_13 = arith.constant 0 : index
    %17 = vector.load %arg6[%c0_12, %c0_13] : memref<128x128xbf16, #tpu.memory_space<vmem>>, vector<128x128xbf16>
    %cst_14 = arith.constant dense<0.000000e+00> : vector<128x128xf32>
    %18 = tpu.matmul %16, %17, %cst_14 {dimension_numbers = #tpu.dot_dimension_numbers<[1], [0], [0], [1], [0, 0, 1, 1], [], []>} : vector<128x128xbf16>, vector<128x128xbf16>, vector<128x128xf32> -> vector<128x128xf32>
    %c0_15 = arith.constant 0 : index
    %c0_16 = arith.constant 0 : index
    %19 = vector.load %arg7[%c0_15, %c0_16] : memref<1x128xf32, #tpu.memory_space<vmem>>, vector<1x128xf32>
    %20 = vector.broadcast %19 : vector<1x128xf32> to vector<128x128xf32>
    %21 = arith.addf %18, %20 : vector<128x128xf32>
    %cst_17 = arith.constant 0.000000e+00 : f32
    %22 = vector.broadcast %cst_17 : f32 to vector<128x128xf32>
    %23 = arith.subf %22, %21 : vector<128x128xf32>
    %24 = math.exp %23 : vector<128x128xf32>
    %cst_18 = arith.constant 1.000000e+00 : f32
    %25 = vector.broadcast %cst_18 : f32 to vector<128x128xf32>
    %26 = arith.addf %25, %24 : vector<128x128xf32>
    %27 = tpu.reciprocal %26 {approx = true} : vector<128x128xf32> -> vector<128x128xf32>
    %c0_19 = arith.constant 0 : index
    %c0_20 = arith.constant 0 : index
    %28 = vector.load %arg8[%c0_19, %c0_20] : memref<128x128xf32, #tpu.memory_space<vmem>>, vector<128x128xf32>
    tpu.vector_store %arg8[%c0_19, %c0_20], %27 {strides = array<i32>} : memref<128x128xf32, #tpu.memory_space<vmem>>, vector<128x128xf32>,
    return
  }
  func.func @transform_0(%arg0: i32) -> (i32, i32) {
    %c0_i32 = arith.constant 0 : i32
    %c0_i32_0 = arith.constant 0 : i32
    return %arg0, %c0_i32 : i32, i32
  }
  func.func @transform_1(%arg0: i32) -> (i32, i32) {
    %c0_i32 = arith.constant 0 : i32
    %c0_i32_0 = arith.constant 0 : i32
    %c0_i32_1 = arith.constant 0 : i32
    return %c0_i32, %c0_i32_0 : i32, i32
  }
  func.func @transform_2(%arg0: i32) -> (i32, i32) {
    %c0_i32 = arith.constant 0 : i32
    %c0_i32_0 = arith.constant 0 : i32
    %c0_i32_1 = arith.constant 0 : i32
    return %c0_i32, %c0_i32_0 : i32, i32
  }
  func.func @transform_3(%arg0: i32) -> (i32, i32) {
    %c0_i32 = arith.constant 0 : i32
    %c0_i32_0 = arith.constant 0 : i32
    %c0_i32_1 = arith.constant 0 : i32
    return %c0_i32, %c0_i32_0 : i32, i32
  }
  func.func @transform_4(%arg0: i32) -> (i32, i32) {
    %c0_i32 = arith.constant 0 : i32
    %c0_i32_0 = arith.constant 0 : i32
    %c0_i32_1 = arith.constant 0 : i32
    return %c0_i32, %c0_i32_0 : i32, i32
  }
  func.func @transform_5(%arg0: i32) -> (i32, i32) {
    %c0_i32 = arith.constant 0 : i32
    %c0_i32_0 = arith.constant 0 : i32
    %c0_i32_1 = arith.constant 0 : i32
    return %c0_i32, %c0_i32_0 : i32, i32
  }
  func.func @transform_6(%arg0: i32) -> (i32, i32) {
    %c0_i32 = arith.constant 0 : i32
    %c0_i32_0 = arith.constant 0 : i32
    %c0_i32_1 = arith.constant 0 : i32
    return %c0_i32, %c0_i32_0 : i32, i32
  }
  func.func @transform_7(%arg0: i32) -> (i32, i32) {
    %c0_i32 = arith.constant 0 : i32
    %c0_i32_0 = arith.constant 0 : i32
    return %arg0, %c0_i32 : i32, i32
  }
}

</mosaic_0001>

<bundles_post_ra>
// kernel: classifier_forward.1
= control target key start
LH: loop header
LB: loop body
LE: loop exit
PB: predicated region body
PF: predicated region fallthrough
CT: control target
= control target key end

     0   :  { %s1409_s24 = smov 0   ;;  %s1593_s0 = inlined_call_operand.vmem [shape: bf16[256,128], index: 0, kind: input, shape index: {}]   ;;  %s1594_s1 = inlined_call_operand.vmem [shape: bf16[128,128], index: 1, kind: input, shape index: {}]   ;;  %s1595_s2 = inlined_call_operand.vmem [shape: f32[1,128], index: 2, kind: input, shape index: {}]   ;;  %s1596_s3 = inlined_call_operand.vmem [shape: bf16[128,128], index: 3, kind: input, shape index: {}]   ;;  %s1597_s4 = inlined_call_operand.vmem [shape: f32[1,128], index: 4, kind: input, shape index: {}]   ;;  %s1598_s5 = inlined_call_operand.vmem [shape: bf16[128,128], index: 5, kind: input, shape index: {}]   ;;  %s1599_s6 = inlined_call_operand.vmem [shape: f32[1,128], index: 6, kind: input, shape index: {}]   ;;  %s1600_s7 = inlined_call_operand.vmem [shape: f32[256,128], index: 7, kind: output, shape index: {}]  }
   0x1 LB: > { %s1051_s25 = sadd.s32 4294967295, %s1367_s24   ;;  %p1055_p0 = scmp.ge.s32.totalorder %s1367_s24, 1  ;;  %s1367_s24 = sphi %s1409_s24, %s17_s24  }
   0x2   : > { %p238_p1 = scmp.lt.s32.totalorder %s1367_s24, 3 }
   0x4   : > { %p239_p2 = pnand %p1055_p0, %p238_p1 }
   0x5   : > { %v1265_v0 = vld [vmem:[%s1594_s1] sm:$0xff] (!%p239_p2)   ;;  %s1056_s28 = sshll.u32 (!%p239_p2), %s1051_s25, 4  ;;  %v1266_v1 = vld [vmem:[%s1594_s1 + $0x8] sm:$0xff] (!%p239_p2)   ;;  %v1267_v2 = vld [vmem:[%s1594_s1 + $0x10] sm:$0xff] (!%p239_p2)  }
   0x6   : > { %242 = sbr.rel (%p239_p2) target bundleno = 753 (0x2f1), region = 48  ;;  %p271_p3 = scmp.lt.s32.totalorder (!%p239_p2), %s1056_s28, 31  ;;  %1145 = vmatprep.subr.bf16.mxu0 (!%p239_p2), %v1265_v0  ;;  %v1268_v3 = vld [vmem:[%s1594_s1 + $0x18] sm:$0xff] (!%p239_p2)   ;;  %v1269_v5 = vld [vmem:[%s1594_s1 + $0x20] sm:$0xff] (!%p239_p2)   ;;  %v1270_v6 = vld [vmem:[%s1594_s1 + $0x28] sm:$0xff] (!%p239_p2)  }
   0x7   : > { %1146 = vmatpush3.bf16.msra.mxu0 (!%p239_p2), %v1265_v0  ;;  %v1281_v7 = vld [vmem:[%s1596_s3] sm:$0xff] (!%p239_p2)   ;;  %v1282_v8 = vld [vmem:[%s1596_s3 + $0x8] sm:$0xff] (!%p239_p2)   ;;  %v1271_v9 = vld [vmem:[%s1594_s1 + $0x30] sm:$0xff] (!%p239_p2)  }
   0x8   : > { %1147 = vmatprep.subr.bf16.mxu0 (!%p239_p2), %v1266_v1  ;;  %1177 = vmatprep.subr.bf16.mxu1 (!%p239_p2), %v1281_v7  ;;  %v1283_v10 = vld [vmem:[%s1596_s3 + $0x10] sm:$0xff] (!%p239_p2)   ;;  %v1272_v11 = vld [vmem:[%s1594_s1 + $0x38] sm:$0xff] (!%p239_p2)   ;;  %v1285_v13 = vld [vmem:[%s1596_s3 + $0x20] sm:$0xff] (!%p239_p2)  }
   0x9   : > { %1178 = vmatpush3.bf16.msra.mxu1 (!%p239_p2), %v1281_v7  ;;  %v1284_v12 = vld [vmem:[%s1596_s3 + $0x18] sm:$0xff] (!%p239_p2)   ;;  %v1286_v16 = vld [vmem:[%s1596_s3 + $0x28] sm:$0xff] (!%p239_p2)   ;;  %v1287_v22 = vld [vmem:[%s1596_s3 + $0x30] sm:$0xff] (!%p239_p2)  }
   0xa   : > { %1179 = vmatprep.subr.bf16.mxu1 (!%p239_p2), %v1282_v8  ;;  %v1288_v23 = vld [vmem:[%s1596_s3 + $0x38] sm:$0xff] (!%p239_p2)   ;;  %v1289_v24 = vld [vmem:[%s1598_s5] sm:$0xff] (!%p239_p2)   ;;  %v1290_v25 = vld [vmem:[%s1598_s5 + $0x8] sm:$0xff] (!%p239_p2)  }
   0xb   : > { %1148 = vmatpush3.bf16.msra.mxu0 (!%p239_p2), %v1266_v1  ;;  %v1291_v26 = vld [vmem:[%s1598_s5 + $0x10] sm:$0xff] (!%p239_p2)   ;;  %v1493_v27 = vld [vmem:[%s1598_s5 + $0x18] sm:$0xff] (!%p239_p2)   ;;  %v1499_v28 = vld [vmem:[%s1598_s5 + $0x20] sm:$0xff] (!%p239_p2)  }
   0xc   : > { %1149 = vmatprep.subr.bf16.mxu0 (!%p239_p2), %v1267_v2  ;;  %v1506_v29 = vld [vmem:[%s1598_s5 + $0x28] sm:$0xff] (!%p239_p2)   ;;  %v1514_v30 = vld [vmem:[%s1595_s2] ss:$0 sm:$0xff] (!%p239_p2) }
   0xd   : > { %s1602_s28 = smov (!%p271_p3, %s1056_s28), 31  ;;  %1180 = vmatpush3.bf16.msra.mxu1 %v1282_v8 }
   0xe   : > { %s1057_s10 = sshll.u32 %s1602_s28, 2  ;;  %1181 = vmatprep.subr.bf16.mxu1 %v1283_v10  ;;  %s1059_s21 = sshll.u32 %s1602_s28, 3 }
   0xf   : > { %s1432_s13 = scalar_lea.vmem %s1593_s0, %s1057_s10  ;;  %1150 = vmatpush3.bf16.msra.mxu0 %v1267_v2  ;;  %s1571_s23 = scalar_lea.vmem %s1600_s7, %s1059_s21 }
  0x10   : > { %v1273_v4 = vld [vmem:[%s1432_s13] sm:$0xff]   ;;  %1151 = vmatprep.subr.bf16.mxu0 %v1268_v3  ;;  %v1274_v14 = vld [vmem:[%s1432_s13 + $0x8] sm:$0xff]   ;;  %v1275_v15 = vld [vmem:[%s1432_s13 + $0x10] sm:$0xff]  }
  0x11   : > { %1161 = vmatprep.mubr.bf16.mxu0 %v1273_v4  ;;  %1182 = vmatpush3.bf16.msra.mxu1 %v1283_v10  ;;  %v1276_v17 = vld [vmem:[%s1432_s13 + $0x18] sm:$0xff]   ;;  %v1277_v18 = vld [vmem:[%s1432_s13 + $0x20] sm:$0xff]   ;;  %v1278_v19 = vld [vmem:[%s1432_s13 + $0x28] sm:$0xff]  }
  0x12   : > { %1183 = vmatprep.subr.bf16.mxu1 %v1284_v12  ;;  %v1279_v20 = vld [vmem:[%s1432_s13 + $0x30] sm:$0xff]   ;;  %v1280_v21 = vld [vmem:[%s1432_s13 + $0x38] sm:$0xff]  }
  0x13   : > { %1152 = vmatpush3.bf16.msra.mxu0 %v1268_v3 }
  0x14   : > { %1153 = vmatprep.subr.bf16.mxu0 %v1269_v5 }
  0x15   : > { %1184 = vmatpush3.bf16.msra.mxu1 %v1284_v12 }
  0x16   : > { %1185 = vmatprep.subr.bf16.mxu1 %v1285_v13 }
  0x17   : > { %1154 = vmatpush3.bf16.msra.mxu0 %v1269_v5 }
  0x18   : > { %1155 = vmatprep.subr.bf16.mxu0 %v1270_v6 }
  0x19   : > { %1186 = vmatpush3.bf16.msra.mxu1 %v1285_v13 }
  0x1a   : > { %1187 = vmatprep.subr.bf16.mxu1 %v1286_v16 }
  0x1b   : > { %1156 = vmatpush3.bf16.msra.mxu0 %v1270_v6 }
  0x1c   : > { %1157 = vmatprep.subr.bf16.mxu0 %v1271_v9 }
  0x1d   : > { %1188 = vmatpush3.bf16.msra.mxu1 %v1286_v16 }
  0x1e   : > { %1189 = vmatprep.subr.bf16.mxu1 %v1287_v22 }
  0x1f   : > { %1158 = vmatpush3.bf16.msra.mxu0 %v1271_v9 }
  0x20   : > { %1159 = vmatprep.subr.bf16.mxu0 %v1272_v11 }
  0x21   : > { %1190 = vmatpush3.bf16.msra.mxu1 %v1287_v22 }
  0x22   : > { %1191 = vmatprep.subr.bf16.mxu1 %v1288_v23 }
  0x23   : > { %1160 = vmatpush3.bf16.msra.mxu0 %v1272_v11 }
  0x24   : > { %1209 = vmatprep.subr.bf16.mxu0 %v1289_v24 }
  0x25   : > { %1192 = vmatpush3.bf16.msra.mxu1 %v1288_v23  ;;  %v1295_v23 = vld [vmem:[%s1598_s5 + $0x30] sm:$0xff]  }
  0x26   : > { %1162 = vmatmul.mubr.bf16.vlgmr.msra.gmra.mrb[0].mxu0 %v1274_v14  ;;  %1241 = vmatprep.subr.bf16.mxu1 %v1289_v24 }
  0x27   : > { %1165 = vmatprep.mubr.bf16.mxu0 %v1275_v15  ;;  %1210 = vmatpush3.bf16.msra.mxu0 %v1289_v24 }
  0x28   : > { %1211 = vmatprep.subr.bf16.mxu0 %v1290_v25 }
  0x2b   : > { %1212 = vmatpush3.bf16.msra.mxu0 %v1290_v25 }
  0x2c   : > { %1213 = vmatprep.subr.bf16.mxu0 %v1291_v26 }
  0x2e   : > { %1166 = vmatmul.mubr.bf16.gmra.mrb[4].mxu0 %v1276_v17 }
  0x2f   : > { %1169 = vmatprep.mubr.bf16.mxu0 %v1277_v18  ;;  %1214 = vmatpush3.bf16.msra.mxu0 %v1291_v26 }
  0x30   : > { %1215 = vmatprep.subr.bf16.mxu0 %v1493_v27 }
  0x33   : > { %1216 = vmatpush3.bf16.msra.mxu0 %v1493_v27 }
  0x34   : > { %1217 = vmatprep.subr.bf16.mxu0 %v1499_v28 }
  0x36   : > { %1170 = vmatmul.mubr.bf16.gmra.mrb[8].mxu0 %v1278_v19 }
  0x37   : > { %1173 = vmatprep.mubr.bf16.mxu0 %v1279_v20  ;;  %1218 = vmatpush3.bf16.msra.mxu0 %v1499_v28 }
  0x38   : > { %1219 = vmatprep.subr.bf16.mxu0 %v1506_v29 }
  0x3b   : > { %1220 = vmatpush3.bf16.msra.mxu0 %v1506_v29 }
  0x3c   : > { %1221 = vmatprep.subr.bf16.mxu0 %v1295_v23 }
  0x3e   : > { %1174 = vmatmul.mubr.bf16.gmra.mrb[12].mxu0 %v1280_v21 }
  0x3f   : > { %1222 = vmatpush3.bf16.msra.mxu0 %v1295_v23 }
  0xf9   : > { %v1163_v31 = vpop.f32.mrb[0].mxu0 }
  0xfa   : > { %v461_v32 = vadd.f32 %v1163_v31, %v1514_v30  ;;  %v452_v33 = vpop.f32.mrb[1].mxu0 }
  0xfb   : > { %v453_v34 = vadd.f32 %v1514_v30, %v452_v33  ;;  %v1164_v35 = vpop.f32.mrb[2].mxu0 }
  0xfc   : > { %v464_v36 = vadd.f32 %v1164_v35, %v1514_v30  ;;  %v455_v37 = vpop.f32.mrb[3].mxu0  ;;  %v517_v39 = vmax.f32 %v461_v32, 0.0 }
  0xfd   : > { %v456_v38 = vadd.f32 %v1514_v30, %v455_v37  ;;  %v515_v41 = vmax.f32 %v453_v34, 0.0 }
  0xfe   : > { %v518_v40 = vmax.f32 %v464_v36, 0.0 }
  0xff   : > { %v516_v42 = vmax.f32 %v456_v38, 0.0 }
 0x100   : > { %v532_v43 = vpack.c.bf16 %v518_v40, %v517_v39 }
 0x101   : > { %v1167_v44 = vpop.f32.mrb[4].mxu0  ;;  %v531_v45 = vpack.c.bf16 %v516_v42, %v515_v41 }
 0x102   : > { %v477_v46 = vadd.f32 %v1167_v44, %v1514_v30  ;;  %v468_v47 = vpop.f32.mrb[5].mxu0 }
 0x103   : > { %v469_v48 = vadd.f32 %v1514_v30, %v468_v47  ;;  %v1168_v49 = vpop.f32.mrb[6].mxu0  ;;  %1193 = vmatprep.mubr.bf16.mxu1 %v531_v45 }
 0x104   : > { %v480_v50 = vadd.f32 %v1168_v49, %v1514_v30  ;;  %v471_v51 = vpop.f32.mrb[7].mxu0  ;;  %1194 = vmatmul.mubr.bf16.vlgmr.msra.gmra.mrb[0].mxu1 %v532_v43  ;;  %v521_v53 = vmax.f32 %v477_v46, 0.0 }
 0x105   : > { %v472_v52 = vadd.f32 %v1514_v30, %v471_v51  ;;  %1249 = vmatpush3.bf16.msra.mxu1 %v1289_v24  ;;  %v519_v55 = vmax.f32 %v469_v48, 0.0  ;;  %v1296_v24 = vld [vmem:[%s1598_s5 + $0x38] sm:$0xff]  }
 0x106   : > { %v522_v54 = vmax.f32 %v480_v50, 0.0  ;;  %1242 = vmatprep.subr.bf16.mxu1 %v1290_v25  ;;  %1223 = vmatprep.subr.bf16.mxu0 %v1296_v24 }
 0x107   : > { %v520_v56 = vmax.f32 %v472_v52, 0.0  ;;  %1224 = vmatpush3.bf16.msra.mxu0 %v1296_v24 }
 0x108   : > { %v534_v57 = vpack.c.bf16 %v522_v54, %v521_v53 }
 0x109   : > { %v533_v58 = vpack.c.bf16 %v520_v56, %v519_v55  ;;  %v1171_v59 = vpop.f32.mrb[8].mxu0  ;;  %1250 = vmatpush3.bf16.msra.mxu1 %v1290_v25  ;;  %v1077_v25 = vld [vmem:[%s1597_s4] ss:$0 sm:$0xff] }
 0x10a   : > { %v493_v60 = vadd.f32 %v1171_v59, %v1514_v30  ;;  %v484_v61 = vpop.f32.mrb[9].mxu0  ;;  %1243 = vmatprep.subr.bf16.mxu1 %v1291_v26 }
 0x10b   : > { %v485_v62 = vadd.f32 %v1514_v30, %v484_v61  ;;  %v1172_v63 = vpop.f32.mrb[10].mxu0  ;;  %1197 = vmatprep.mubr.bf16.mxu1 %v533_v58 }
 0x10c   : > { %v496_v0 = vadd.f32 %v1172_v63, %v1514_v30  ;;  %v487_v1 = vpop.f32.mrb[11].mxu0  ;;  %1198 = vmatmul.mubr.bf16.gmra.mrb[4].mxu1 %v534_v57  ;;  %v525_v3 = vmax.f32 %v493_v60, 0.0 }
 0x10d   : > { %v488_v2 = vadd.f32 %v1514_v30, %v487_v1  ;;  %1251 = vmatpush3.bf16.msra.mxu1 %v1291_v26  ;;  %v523_v5 = vmax.f32 %v485_v62, 0.0 }
 0x10e   : > { %v526_v4 = vmax.f32 %v496_v0, 0.0  ;;  %1244 = vmatprep.subr.bf16.mxu1 %v1493_v27 }
 0x10f   : > { %v524_v6 = vmax.f32 %v488_v2, 0.0 }
 0x110   : > { %v536_v7 = vpack.c.bf16 %v526_v4, %v525_v3 }
 0x111   : > { %v535_v8 = vpack.c.bf16 %v524_v6, %v523_v5  ;;  %v1175_v9 = vpop.f32.mrb[12].mxu0  ;;  %1252 = vmatpush3.bf16.msra.mxu1 %v1493_v27 }
 0x112   : > { %v509_v10 = vadd.f32 %v1175_v9, %v1514_v30  ;;  %v500_v11 = vpop.f32.mrb[13].mxu0  ;;  %1245 = vmatprep.subr.bf16.mxu1 %v1499_v28 }
 0x113   : > { %v501_v12 = vadd.f32 %v1514_v30, %v500_v11  ;;  %v1176_v13 = vpop.f32.mrb[14].mxu0  ;;  %1201 = vmatprep.mubr.bf16.mxu1 %v535_v8 }
 0x114   : > { %v512_v14 = vadd.f32 %v1176_v13, %v1514_v30  ;;  %v503_v15 = vpop.f32.mrb[15].mxu0  ;;  %1202 = vmatmul.mubr.bf16.gmra.mrb[8].mxu1 %v536_v7  ;;  %v529_v17 = vmax.f32 %v509_v10, 0.0 }
 0x115   : > { %v504_v16 = vadd.f32 %v1514_v30, %v503_v15  ;;  %1253 = vmatpush3.bf16.msra.mxu1 %v1499_v28  ;;  %v527_v19 = vmax.f32 %v501_v12, 0.0 }
 0x116   : > { %v530_v18 = vmax.f32 %v512_v14, 0.0  ;;  %1246 = vmatprep.subr.bf16.mxu1 %v1506_v29 }
 0x117   : > { %v528_v20 = vmax.f32 %v504_v16, 0.0 }
 0x118   : > { %v538_v21 = vpack.c.bf16 %v530_v18, %v529_v17  ;;  %v1550_v18 = vld [vmem:[%s1599_s6] ss:$0 sm:$0xff] }
 0x119   : > { %v537_v22 = vpack.c.bf16 %v528_v20, %v527_v19  ;;  %1254 = vmatpush3.bf16.msra.mxu1 %v1506_v29 }
 0x11a   : > { %1247 = vmatprep.subr.bf16.mxu1 %v1295_v23 }
 0x11b   : > { %1205 = vmatprep.mubr.bf16.mxu1 %v537_v22 }
 0x11c   : > { %1206 = vmatmul.mubr.bf16.gmra.mrb[12].mxu1 %v538_v21 }
 0x11d   : > { %1255 = vmatpush3.bf16.msra.mxu1 %v1295_v23 }
 0x11e   : > { %1248 = vmatprep.subr.bf16.mxu1 %v1296_v24 }
 0x121   : > { %1256 = vmatpush3.bf16.msra.mxu1 %v1296_v24 }
 0x1d7   : > { %v1195_v26 = vpop.f32.mrb[0].mxu1 }
 0x1d8   : > { %v653_v27 = vadd.f32 %v1195_v26, %v1077_v25  ;;  %v644_v28 = vpop.f32.mrb[1].mxu1 }
 0x1d9   : > { %v645_v29 = vadd.f32 %v1077_v25, %v644_v28  ;;  %v1196_v30 = vpop.f32.mrb[2].mxu1 }
 0x1da   : > { %v656_v31 = vadd.f32 %v1196_v30, %v1077_v25  ;;  %v647_v32 = vpop.f32.mrb[3].mxu1  ;;  %v709_v34 = vmax.f32 %v653_v27, 0.0 }
 0x1db   : > { %v648_v33 = vadd.f32 %v1077_v25, %v647_v32  ;;  %v707_v36 = vmax.f32 %v645_v29, 0.0 }
 0x1dc   : > { %v710_v35 = vmax.f32 %v656_v31, 0.0 }
 0x1dd   : > { %v708_v37 = vmax.f32 %v648_v33, 0.0 }
 0x1de   : > { %v724_v38 = vpack.c.bf16 %v710_v35, %v709_v34 }
 0x1df   : > { %v723_v39 = vpack.c.bf16 %v708_v37, %v707_v36  ;;  %v1199_v40 = vpop.f32.mrb[4].mxu1 }
 0x1e0   : > { %v669_v41 = vadd.f32 %v1199_v40, %v1077_v25  ;;  %v660_v42 = vpop.f32.mrb[5].mxu1 }
 0x1e1   : > { %v661_v43 = vadd.f32 %v1077_v25, %v660_v42  ;;  %v1200_v44 = vpop.f32.mrb[6].mxu1  ;;  %1225 = vmatprep.mubr.bf16.mxu0 %v723_v39 }
 0x1e2   : > { %v672_v45 = vadd.f32 %v1200_v44, %v1077_v25  ;;  %v663_v46 = vpop.f32.mrb[7].mxu1  ;;  %1226 = vmatmul.mubr.bf16.vlgmr.msra.gmra.mrb[16].mxu0 %v724_v38  ;;  %v713_v48 = vmax.f32 %v669_v41, 0.0 }
 0x1e3   : > { %v664_v47 = vadd.f32 %v1077_v25, %v663_v46  ;;  %v711_v50 = vmax.f32 %v661_v43, 0.0 }
 0x1e4   : > { %v714_v49 = vmax.f32 %v672_v45, 0.0 }
 0x1e5   : > { %v712_v51 = vmax.f32 %v664_v47, 0.0 }
 0x1e6   : > { %v726_v52 = vpack.c.bf16 %v714_v49, %v713_v48 }
 0x1e7   : > { %v725_v53 = vpack.c.bf16 %v712_v51, %v711_v50  ;;  %v1203_v54 = vpop.f32.mrb[8].mxu1 }
 0x1e8   : > { %v685_v55 = vadd.f32 %v1203_v54, %v1077_v25  ;;  %v676_v56 = vpop.f32.mrb[9].mxu1 }
 0x1e9   : > { %v677_v57 = vadd.f32 %v1077_v25, %v676_v56  ;;  %v1204_v58 = vpop.f32.mrb[10].mxu1  ;;  %1229 = vmatprep.mubr.bf16.mxu0 %v725_v53 }
 0x1ea   : > { %v688_v59 = vadd.f32 %v1204_v58, %v1077_v25  ;;  %v679_v60 = vpop.f32.mrb[11].mxu1  ;;  %1230 = vmatmul.mubr.bf16.gmra.mrb[20].mxu0 %v726_v52  ;;  %v717_v62 = vmax.f32 %v685_v55, 0.0 }
 0x1eb   : > { %v680_v61 = vadd.f32 %v1077_v25, %v679_v60  ;;  %v715_v0 = vmax.f32 %v677_v57, 0.0 }
 0x1ec   : > { %v718_v63 = vmax.f32 %v688_v59, 0.0 }
 0x1ed   : > { %v716_v1 = vmax.f32 %v680_v61, 0.0 }
 0x1ee   : > { %v728_v2 = vpack.c.bf16 %v718_v63, %v717_v62 }
 0x1ef   : > { %v727_v3 = vpack.c.bf16 %v716_v1, %v715_v0  ;;  %v1207_v4 = vpop.f32.mrb[12].mxu1 }
 0x1f0   : > { %v701_v5 = vadd.f32 %v1207_v4, %v1077_v25  ;;  %v692_v6 = vpop.f32.mrb[13].mxu1 }
 0x1f1   : > { %v693_v7 = vadd.f32 %v1077_v25, %v692_v6  ;;  %v1208_v8 = vpop.f32.mrb[14].mxu1  ;;  %1233 = vmatprep.mubr.bf16.mxu1 %v727_v3 }
 0x1f2   : > { %v704_v9 = vadd.f32 %v1208_v8, %v1077_v25  ;;  %v695_v10 = vpop.f32.mrb[15].mxu1  ;;  %1234 = vmatmul.mubr.bf16.vlgmr.msra.gmra.mrb[16].mxu1 %v728_v2  ;;  %v721_v12 = vmax.f32 %v701_v5, 0.0 }
 0x1f3   : > { %v696_v11 = vadd.f32 %v1077_v25, %v695_v10  ;;  %v719_v14 = vmax.f32 %v693_v7, 0.0 }
 0x1f4   : > { %v722_v13 = vmax.f32 %v704_v9, 0.0 }
 0x1f5   : > { %v720_v15 = vmax.f32 %v696_v11, 0.0 }
 0x1f6   : > { %v730_v16 = vpack.c.bf16 %v722_v13, %v721_v12 }
 0x1f7   : > { %v729_v17 = vpack.c.bf16 %v720_v15, %v719_v14 }
 0x1f9   : > { %1237 = vmatprep.mubr.bf16.mxu1 %v729_v17 }
 0x1fa   : > { %1238 = vmatmul.mubr.bf16.gmra.mrb[20].mxu1 %v730_v16 }
 0x2b5   : > { %v1227_v19 = vpop.f32.mrb[16].mxu0 }
 0x2b6   : > { %v845_v20 = vadd.f32 %v1227_v19, %v1550_v18  ;;  %v836_v21 = vpop.f32.mrb[17].mxu0 }
 0x2b7   : > { %v837_v22 = vadd.f32 %v1550_v18, %v836_v21  ;;  %v1228_v23 = vpop.f32.mrb[18].mxu0 }
 0x2b8   : > { %v901_v24 = vsub.f32 0.0, %v845_v20  ;;  %v848_v25 = vadd.f32 %v1228_v23, %v1550_v18  ;;  %v839_v26 = vpop.f32.mrb[19].mxu0 }
 0x2b9   : > { %v899_v27 = vsub.f32 0.0, %v837_v22  ;;  %v840_v28 = vadd.f32 %v1550_v18, %v839_v26 }
 0x2ba   : > { %v919_v29 = vmul.f32 1.442695, %v901_v24  ;;  %v902_v30 = vsub.f32 0.0, %v848_v25 }
 0x2bb   : > { %v915_v31 = vmul.f32 1.442695, %v899_v27  ;;  %v900_v32 = vsub.f32 0.0, %v840_v28 }
 0x2bc   : > { %1297 = vpow2.f32 %v919_v29  ;;  %v921_v33 = vmul.f32 1.442695, %v902_v30 }
 0x2bd   : > { %1299 = vpow2.f32 %v915_v31  ;;  %v917_v34 = vmul.f32 1.442695, %v900_v32  ;;  %v1231_v35 = vpop.f32.mrb[20].mxu0 }
 0x2be   : > { %1301 = vpow2.f32 %v921_v33  ;;  %v861_v36 = vadd.f32 %v1231_v35, %v1550_v18  ;;  %v852_v37 = vpop.f32.mrb[21].mxu0 }
 0x2bf   : > { %1303 = vpow2.f32 %v917_v34  ;;  %v853_v38 = vadd.f32 %v1550_v18, %v852_v37  ;;  %v1232_v39 = vpop.f32.mrb[22].mxu0 }
 0x2c0   : > { %v905_v40 = vsub.f32 0.0, %v861_v36  ;;  %v864_v41 = vadd.f32 %v1232_v39, %v1550_v18  ;;  %v855_v42 = vpop.f32.mrb[23].mxu0 }
 0x2c1   : > { %v903_v43 = vsub.f32 0.0, %v853_v38  ;;  %v856_v44 = vadd.f32 %v1550_v18, %v855_v42 }
 0x2c2   : > { %v927_v45 = vmul.f32 1.442695, %v905_v40  ;;  %v906_v46 = vsub.f32 0.0, %v864_v41 }
 0x2c3   : > { %v923_v47 = vmul.f32 1.442695, %v903_v43  ;;  %v904_v48 = vsub.f32 0.0, %v856_v44 }
 0x2c4   : > { %1305 = vpow2.f32 %v927_v45  ;;  %v929_v49 = vmul.f32 1.442695, %v906_v46 }
 0x2c5   : > { %1307 = vpow2.f32 %v923_v47  ;;  %v925_v50 = vmul.f32 1.442695, %v904_v48  ;;  %v1235_v51 = vpop.f32.mrb[16].mxu1 }
 0x2c6   : > { %v1298_v52 = vpop.eup %1297  ;;  %1309 = vpow2.f32 %v929_v49  ;;  %v877_v53 = vadd.f32 %v1235_v51, %v1550_v18  ;;  %v868_v54 = vpop.f32.mrb[17].mxu1 }
 0x2c7   : > { %v1300_v55 = vpop.eup %1299  ;;  %v949_v56 = vadd.f32 1.0, %v1298_v52  ;;  %1311 = vpow2.f32 %v925_v50  ;;  %v869_v57 = vadd.f32 %v1550_v18, %v868_v54  ;;  %v1236_v58 = vpop.f32.mrb[18].mxu1 }
 0x2c8   : > { %v1302_v59 = vpop.eup %1301  ;;  %v947_v60 = vadd.f32 1.0, %v1300_v55  ;;  %v909_v61 = vsub.f32 0.0, %v877_v53  ;;  %v880_v62 = vadd.f32 %v1236_v58, %v1550_v18  ;;  %v871_v63 = vpop.f32.mrb[19].mxu1 }
 0x2c9   : > { %v1304_v0 = vpop.eup %1303  ;;  %1313 = vrcp.f32 %v949_v56  ;;  %v950_v1 = vadd.f32 1.0, %v1302_v59  ;;  %v907_v2 = vsub.f32 0.0, %v869_v57  ;;  %v872_v3 = vadd.f32 %v1550_v18, %v871_v63 }
 0x2ca   : > { %1315 = vrcp.f32 %v947_v60  ;;  %v948_v4 = vadd.f32 1.0, %v1304_v0  ;;  %v935_v5 = vmul.f32 1.442695, %v909_v61  ;;  %v910_v6 = vsub.f32 0.0, %v880_v62 }
 0x2cb   : > { %1317 = vrcp.f32 %v950_v1  ;;  %v931_v7 = vmul.f32 1.442695, %v907_v2  ;;  %v908_v8 = vsub.f32 0.0, %v872_v3 }
 0x2cc   : > { %1319 = vrcp.f32 %v948_v4  ;;  %v937_v9 = vmul.f32 1.442695, %v910_v6 }
 0x2cd   : > { %1321 = vpow2.f32 %v935_v5  ;;  %v933_v10 = vmul.f32 1.442695, %v908_v8  ;;  %v1239_v11 = vpop.f32.mrb[20].mxu1 }
 0x2ce   : > { %v1306_v12 = vpop.eup %1305  ;;  %1323 = vpow2.f32 %v931_v7  ;;  %v893_v13 = vadd.f32 %v1239_v11, %v1550_v18  ;;  %v884_v14 = vpop.f32.mrb[21].mxu1 }
 0x2cf   : > { %v1308_v15 = vpop.eup %1307  ;;  %v953_v16 = vadd.f32 1.0, %v1306_v12  ;;  %1325 = vpow2.f32 %v937_v9  ;;  %v885_v17 = vadd.f32 %v1550_v18, %v884_v14  ;;  %v1240_v19 = vpop.f32.mrb[22].mxu1 }
 0x2d0   : > { %v1310_v20 = vpop.eup %1309  ;;  %v951_v21 = vadd.f32 1.0, %v1308_v15  ;;  %1327 = vpow2.f32 %v933_v10  ;;  %v913_v22 = vsub.f32 0.0, %v893_v13  ;;  %v896_v23 = vadd.f32 %v1240_v19, %v1550_v18  ;;  %v887_v24 = vpop.f32.mrb[23].mxu1 }
 0x2d1   : > { %v1312_v25 = vpop.eup %1311  ;;  %1329 = vrcp.f32 %v953_v16  ;;  %v954_v26 = vadd.f32 1.0, %v1310_v20  ;;  %v911_v27 = vsub.f32 0.0, %v885_v17  ;;  %v888_v28 = vadd.f32 %v1550_v18, %v887_v24 }
 0x2d2   : > { %1331 = vrcp.f32 %v951_v21  ;;  %v952_v29 = vadd.f32 1.0, %v1312_v25  ;;  %v943_v30 = vmul.f32 1.442695, %v913_v22  ;;  %v914_v31 = vsub.f32 0.0, %v896_v23 }
 0x2d3   : > { %v1314_v32 = vpop.eup %1313  ;;  %1333 = vrcp.f32 %v954_v26  ;;  %v939_v33 = vmul.f32 1.442695, %v911_v27  ;;  %v912_v34 = vsub.f32 0.0, %v888_v28 }
 0x2d4   : > { %v1316_v35 = vpop.eup %1315  ;;  %981 = vst [vmem:[%s1571_s23 + $0x10] sm:$0xff] %v1314_v32  ;;  %1335 = vrcp.f32 %v952_v29  ;;  %v945_v36 = vmul.f32 1.442695, %v914_v31 }
 0x2d5   : > { %v1318_v37 = vpop.eup %1317  ;;  %979 = vst [vmem:[%s1571_s23] sm:$0xff] %v1316_v35  ;;  %1337 = vpow2.f32 %v943_v30  ;;  %v941_v38 = vmul.f32 1.442695, %v912_v34 }
 0x2d6   : > { %v1320_v39 = vpop.eup %1319  ;;  %982 = vst [vmem:[%s1571_s23 + $0x18] sm:$0xff] %v1318_v37  ;;  %1339 = vpow2.f32 %v939_v33 }
 0x2d7   : > { %v1322_v18 = vpop.eup %1321  ;;  %980 = vst [vmem:[%s1571_s23 + $0x8] sm:$0xff] %v1320_v39  ;;  %1341 = vpow2.f32 %v945_v36 }
 0x2d8   : > { %v1324_v40 = vpop.eup %1323  ;;  %v957_v41 = vadd.f32 1.0, %v1322_v18  ;;  %1343 = vpow2.f32 %v941_v38 }
 0x2d9   : > { %v1326_v42 = vpop.eup %1325  ;;  %v955_v43 = vadd.f32 1.0, %v1324_v40 }
 0x2da   : > { %v1328_v44 = vpop.eup %1327  ;;  %1345 = vrcp.f32 %v957_v41  ;;  %v958_v45 = vadd.f32 1.0, %v1326_v42 }
 0x2db   : > { %v1330_v46 = vpop.eup %1329  ;;  %1347 = vrcp.f32 %v955_v43  ;;  %v956_v47 = vadd.f32 1.0, %v1328_v44 }
 0x2dc   : > { %v1332_v48 = vpop.eup %1331  ;;  %985 = vst [vmem:[%s1571_s23 + $0x30] sm:$0xff] %v1330_v46  ;;  %1349 = vrcp.f32 %v958_v45 }
 0x2dd   : > { %v1334_v49 = vpop.eup %1333  ;;  %983 = vst [vmem:[%s1571_s23 + $0x20] sm:$0xff] %v1332_v48  ;;  %1351 = vrcp.f32 %v956_v47 }
 0x2de   : > { %v1336_v50 = vpop.eup %1335  ;;  %986 = vst [vmem:[%s1571_s23 + $0x38] sm:$0xff] %v1334_v49 }
 0x2df   : > { %v1338_v51 = vpop.eup %1337  ;;  %984 = vst [vmem:[%s1571_s23 + $0x28] sm:$0xff] %v1336_v50 }
 0x2e0   : > { %v1340_v52 = vpop.eup %1339  ;;  %v961_v53 = vadd.f32 1.0, %v1338_v51 }
 0x2e1   : > { %v1342_v54 = vpop.eup %1341  ;;  %v959_v55 = vadd.f32 1.0, %v1340_v52 }
 0x2e2   : > { %v1344_v56 = vpop.eup %1343  ;;  %1353 = vrcp.f32 %v961_v53  ;;  %v962_v57 = vadd.f32 1.0, %v1342_v54 }
 0x2e3   : > { %1355 = vrcp.f32 %v959_v55  ;;  %v960_v58 = vadd.f32 1.0, %v1344_v56 }
 0x2e4   : > { %v1346_v59 = vpop.eup %1345  ;;  %1357 = vrcp.f32 %v962_v57 }
 0x2e5   : > { %v1348_v60 = vpop.eup %1347  ;;  %989 = vst [vmem:[%s1571_s23 + $0x50] sm:$0xff] %v1346_v59  ;;  %1359 = vrcp.f32 %v960_v58 }
 0x2e6   : > { %v1350_v61 = vpop.eup %1349  ;;  %987 = vst [vmem:[%s1571_s23 + $0x40] sm:$0xff] %v1348_v60 }
 0x2e7   : > { %v1352_v62 = vpop.eup %1351  ;;  %990 = vst [vmem:[%s1571_s23 + $0x58] sm:$0xff] %v1350_v61 }
 0x2e8   : > { %988 = vst [vmem:[%s1571_s23 + $0x48] sm:$0xff] %v1352_v62 }
 0x2ec   : > { %v1354_v63 = vpop.eup %1353 }
 0x2ed   : > { %v1356_v0 = vpop.eup %1355  ;;  %993 = vst [vmem:[%s1571_s23 + $0x70] sm:$0xff] %v1354_v63 }
 0x2ee   : > { %v1358_v1 = vpop.eup %1357  ;;  %991 = vst [vmem:[%s1571_s23 + $0x60] sm:$0xff] %v1356_v0 }
 0x2ef   : > { %v1360_v2 = vpop.eup %1359  ;;  %994 = vst [vmem:[%s1571_s23 + $0x78] sm:$0xff] %v1358_v1 }
 0x2f0   : > { %992 = vst [vmem:[%s1571_s23 + $0x68] sm:$0xff] %v1360_v2 }
 0x2f1 PF: > { %s17_s24 = sadd.s32 1, %s1367_s24  }
 0x2f2   : > { %p14_p4 = scmp.ge.s32.totalorder %s17_s24, 4  }
 0x2f4   :  { %16 = sbr.rel (!%p14_p4) target bundleno = 1 (0x1), region = 78 }

</bundles_post_ra>
